<compile_context>
chip_gen: v5e
topology: v5e:2x2
jax: 0.10.0
libtpu: 0.0.40
codegen_flags: <defaults>
</compile_context>

<pallas_src>
import math

import jax
import jax.numpy as jnp
from jax.experimental import pallas as pl
from jax.experimental.pallas import tpu as pltpu


def _identity_kernel(x_ref, o_ref):
    # Hot path: straight VMEM copy of the current tile (no reshapes/slices).
    o_ref[...] = x_ref[...]


_LANE_CANDIDATES = (1024, 512, 256, 128)   # lane-dense last dims, widest first
_SMALL_BYTES = 2 << 20                     # single-block fast-path threshold
_TARGET_BLOCK_BYTES = 8 << 20              # big tiles: per-step overhead ~6% on v7x
_MIN_GRID_STEPS = 8                        # keep both v7x TCs + pipeline busy


def _vmem_cap_bytes():
    """~60% of the device's physical VMEM (64 MiB v7x, 128 MiB v5e/v6e)."""
    try:
        return int(0.6 * pltpu.get_tpu_info().vmem_capacity_bytes)
    except Exception:
        return 38 << 20  # conservative v7x-safe fallback


def _debug_forward(x):
    """Identity forward with shape print, computed via a Pallas copy kernel."""
    # Side effect from the reference module: print the (static) shape.
    # TODO(synk): under jit this fires once per trace, not per call
    # (use jax.debug.print for per-call semantics if ever required).
    print(tuple(x.shape))

    orig_shape = x.shape
    total = int(math.prod(orig_shape)) if orig_shape else 1
    if total == 0:
        return x

    itemsize = jnp.dtype(x.dtype).itemsize
    sub = {8: 8, 4: 8, 2: 16, 1: 32}.get(itemsize)
    if sub is None:
        # TODO(synk): sub-byte packed dtypes (int4/fp4) need packing-aware
        # sublane alignment; identity semantics are preserved by returning x.
        return x

    # Divisor-aware lane choice: avoids any pad/slice for these counts.
    lane = next((c for c in _LANE_CANDIDATES if total % c == 0), None)

    total_bytes = total * itemsize

    # ---------------- small-input fast path: single full-array block -------
    if total_bytes <= _SMALL_BYTES:
        if lane is not None:
            x2d = x.reshape(total // lane, lane)
        elif len(orig_shape) >= 2:
            x2d = x.reshape(-1, orig_shape[-1])
        else:
            x2d = x.reshape(1, total)
        y2d = pl.pallas_call(
            _identity_kernel,
            out_shape=jax.ShapeDtypeStruct(x2d.shape, x2d.dtype),
        )(x2d)
        return y2d.reshape(orig_shape)

    # ---------------- large-input tiled, pipelined path ---------------------
    padded_total = total
    if lane is None:
        # Rare fallback: no clean lane divisor -> minimal pad (< 128 elems).
        lane = 128
        padded_total = -(-total // lane) * lane
    rows = padded_total // lane

    # ~8 MiB blocks, rows a multiple of the dtype-aligned sublane count.
    target_rows = max(sub, (_TARGET_BLOCK_BYTES // (lane * itemsize)) // sub * sub)
    # Cap so the grid has at least ~_MIN_GRID_STEPS steps.
    rows_per_step = -(-rows // _MIN_GRID_STEPS)          # ceil(rows / 8)
    rows_per_step = -(-rows_per_step // sub) * sub        # round up to `sub`
    tile_rows = max(sub, min(target_rows, rows_per_step))

    block = (tile_rows, lane)
    block_bytes = tile_rows * lane * itemsize
    vmem_limit = int(min(max(4 * block_bytes + (2 << 20), 16 << 20),
                         _vmem_cap_bytes()))

    xf = x.reshape(-1)
    if padded_total != total:
        xf = jnp.pad(xf, (0, padded_total - total))
    x2d = xf.reshape(rows, lane)

    # cdiv grid: Pallas masks the partial last block -> no row padding needed.
    grid = (pl.cdiv(rows, tile_rows),)

    y2d = pl.pallas_call(
        _identity_kernel,
        out_shape=jax.ShapeDtypeStruct(x2d.shape, x2d.dtype),
        grid=grid,
        in_specs=[pl.BlockSpec(block, lambda i: (i, 0))],
        out_specs=pl.BlockSpec(block, lambda i: (i, 0)),
        compiler_params=pltpu.CompilerParams(
            dimension_semantics=("parallel",),
            vmem_limit_bytes=vmem_limit,
        ),
        cost_estimate=pl.CostEstimate(
            flops=0,
            transcendentals=0,
            bytes_accessed=2 * total * itemsize,
        ),
    )(x2d)

    yf = y2d.reshape(-1)
    if padded_total != total:
        yf = yf[:total]
    return yf.reshape(orig_shape)


if __name__ == "__main__":
    key = jax.random.PRNGKey(0)
    k_small, k_big = jax.random.split(key)

    # Small NCHW input consistent with the module's conv-style usage
    # (takes the single-block fast path).
    x_small = jax.random.normal(k_small, (2, 4, 16, 16), dtype=jnp.float32)
    y_small = jax.block_until_ready(_debug_forward(x_small))
    assert y_small.shape == x_small.shape
    assert y_small.dtype == x_small.dtype
    assert bool(jnp.all(y_small == x_small))

    # Medium input that exercises the tiled, masked-last-block path
    # (rows = 5000 is not a multiple of the chosen tile_rows).
    x_big = jax.random.normal(k_big, (5, 1000, 1024), dtype=jnp.float32)
    y_big = jax.block_until_ready(_debug_forward(x_big))
    assert y_big.shape == x_big.shape
    assert y_big.dtype == x_big.dtype
    assert bool(jnp.all(y_big == x_big))

    print("KERNEL_OK")
</pallas_src>

<mosaic_0001>
module attributes {stable_mosaic.version = 11 : i64} {
  func.func @_identity_kernel(%arg0: memref<2x1024xf32, #tpu.memory_space<vmem>>, %arg1: memref<2x1024xf32, #tpu.memory_space<vmem>>) attributes {dimension_semantics = [], scalar_prefetch = 0 : i64, scratch_operands = 0 : i64, tpu.core_type = #tpu.core_type<tc>} {
    %c0 = arith.constant 0 : index
    %c0_0 = arith.constant 0 : index
    %0 = vector.load %arg0[%c0, %c0_0] : memref<2x1024xf32, #tpu.memory_space<vmem>>, vector<2x1024xf32>
    %c0_1 = arith.constant 0 : index
    %c0_2 = arith.constant 0 : index
    %1 = vector.load %arg1[%c0_1, %c0_2] : memref<2x1024xf32, #tpu.memory_space<vmem>>, vector<2x1024xf32>
    tpu.vector_store %arg1[%c0_1, %c0_2], %0 {strides = array<i32>} : memref<2x1024xf32, #tpu.memory_space<vmem>>, vector<2x1024xf32>,
    return
  }
}

</mosaic_0001>

<bundles_post_ra>
// kernel: tpu_custom_call.1
= control target key start
LH: loop header
LB: loop body
LE: loop exit
PB: predicated region body
PF: predicated region fallthrough
CT: control target
= control target key end

     0   :  { %6 = vsyncpa [#allocation3], 0  ;;  %s116_s0 = inlined_call_operand.hbm [shape: f32[2,1024], index: 0, kind: input, shape index: {}]   ;;  %s117_s1 = inlined_call_operand.hbm [shape: f32[2,1024], index: 1, kind: output, shape index: {}]  }
   0x1   :  { %7 = vsyncpa [#allocation4], 0  ;;  %s13_s8 = sshll.u32 %s116_s0, 4  ;;  %s98_s9 = smov [#allocation2]   ;;  %s14_s8 = int_to_ptr.hbm [resolvable:$true] %s13_s8 }
   0x2   :  { %s15_s10 = sshll.u32 %s98_s9, 4  ;;  %s16_s10 = int_to_ptr.vmem [resolvable:$true] %s15_s10 }
   0x3   :  { %18 = dma.hbm_to_vmem [thread:$0]  %s14_s8, 256, %s16_s10, [#allocation3]  }
   0x4   :  { %94 = dma.done.wait [#allocation3], 256  }
   0x5   :  { %95 = vsyncadd [#allocation3], 4294967040  ;;  %s99_s11 = smov [#allocation5]   ;;  %s34_s15 = sshll.u32 %s117_s1, 4  ;;  %v23_v0 = vld [vmem:[#allocation2] sm:$0xff]  ;;  %v24_v1 = vld [vmem:[#allocation2 + $0x8] sm:$0xff]  ;;  %s35_s15 = int_to_ptr.hbm [resolvable:$true] %s34_s15 }
   0x6   :  { %s32_s12 = sshll.u32 %s99_s11, 4  ;;  %25 = vst [vmem:[#allocation5] sm:$0xff] %v23_v0  ;;  %s33_s12 = int_to_ptr.vmem [resolvable:$true] %s32_s12 }
   0x7   :  { %26 = vst [vmem:[#allocation5 + $0x8] sm:$0xff] %v24_v1 }
   0x8   :  { %37 = dma.vmem_to_hbm [thread:$0]  %s33_s12, 256, %s35_s15, [#allocation4]  }
   0x9   :  { %96 = dma.done.wait [#allocation4], 256  }
   0xa   :  { %97 = vsyncadd [#allocation4], 4294967040 }
   0xb   :  { %42 = vsyncpa [#allocation3], 1 }
   0xc   :  { %43 = vsyncpa [#allocation4], 1 }

</bundles_post_ra>
